<compile_context>
chip_gen: v7x
topology: tpu7x:2x2x1
jax: 0.10.0
libtpu: 0.0.40
codegen_flags: <defaults>
</compile_context>

<pallas_src>
import functools

import jax
import jax.numpy as jnp
from jax.experimental import pallas as pl
from jax.experimental.pallas import tpu as pltpu

_LANE = 128


def _focal_kernel(logits_ref, target_ref, loss_ref, *, gamma, class_num, alpha):
    # logits_ref: (C, TM, 128)   target_ref / loss_ref: (TM, 128)
    t = target_ref[...]

    # Load each class slab once, upcast to f32 after the load.
    xs = [logits_ref[c].astype(jnp.float32) for c in range(class_num)]

    # numerically stable softmax over the (static) class axis
    m = xs[0]
    for c in range(1, class_num):
        m = jnp.maximum(m, xs[c])

    s = jnp.zeros_like(m)   # sum_c exp(x_c - m)
    xt = jnp.zeros_like(m)  # x_target - m      (one-hot gather via selects)
    et = jnp.zeros_like(m)  # exp(x_target - m) (reuse the exp from the loop)
    for c in range(class_num):
        xc = xs[c] - m
        ec = jnp.exp(xc)
        s = s + ec
        sel = t == c
        xt = jnp.where(sel, xc, xt)
        et = jnp.where(sel, ec, et)

    # exact divide: fixes the approx-reciprocal error seen previously
    probs = et / s
    # exact log-prob: (x_t - m) - log(sum exp)
    log_p = xt - jnp.log(s)
    # probs <= 1 by construction, but clamp so non-even / non-integer gamma
    # never sees a tiny negative base
    one_minus_p = jnp.maximum(1.0 - probs, 0.0)
    # gamma is a static Python number -> integer_pow / VPU multiply chain
    focal = -(one_minus_p ** gamma) * log_p

    if alpha is not None:
        # per-sample alpha built in-kernel from the static per-class values
        a = jnp.zeros_like(m)
        for c in range(class_num):
            a = jnp.where(t == c, jnp.float32(alpha[c]), a)
        focal = a * focal

    loss_ref[...] = focal


@functools.partial(jax.jit,
                   static_argnames=("gamma", "alpha", "reduction", "block_rows"))
def multi_ce_focal_loss(predict, target, gamma=2, alpha=None, reduction="none",
                        block_rows=512):
    """Pallas implementation of MultiCEFocalLoss.forward.

    predict: (N, C) logits (f32 or bf16), target: (N,) int class ids.
    alpha: None or a static tuple of C per-class weights.
    Returns (N, 1) for reduction='none' (matching the PyTorch module).
    """
    n, c = predict.shape
    target = target.astype(jnp.int32).reshape(-1)
    assert target.shape[0] == n

    alpha_t = None if alpha is None else tuple(float(a) for a in alpha)
    assert alpha_t is None or len(alpha_t) == c

    # --- tile sizing: rows of 128 samples, tm sized against C and VMEM budget.
    rows = pl.cdiv(n, _LANE)
    logit_bytes = jnp.dtype(predict.dtype).itemsize
    vmem_budget = 8 * 1024 * 1024  # conservative: fits v5e/v6e/v7x scoped defaults
    per_row_bytes = 2 * _LANE * (c * logit_bytes + 4 + 4)  # double-buffered in+tgt+out
    tm_cap = max(8, (vmem_budget // per_row_bytes) // 8 * 8)
    tm = max(8, min(block_rows, tm_cap))
    steps = pl.cdiv(rows, tm)
    # give v7x's second TensorCore a grid step for mid-size batches (>=256 rows each)
    if steps == 1 and rows >= 2 * 256:
        steps = 2
    tm = max(8, ((pl.cdiv(rows, steps) + 7) // 8) * 8)
    rows_pad = steps * tm
    n_pad = rows_pad * _LANE
    pad = n_pad - n

    # glue (fused under jit): pad the sample axis, go class-major (C, rows, 128).
    # TODO(synk): if the caller hands over class-major logits directly this
    # transpose copy (one extra HBM pass over the logits) disappears.
    logits_cm = jnp.pad(predict, ((0, pad), (0, 0))).T.reshape(c, rows_pad, _LANE)
    tgt = jnp.pad(target, (0, pad)).reshape(rows_pad, _LANE)

    kernel = functools.partial(_focal_kernel, gamma=gamma, class_num=c,
                               alpha=alpha_t)
    out = pl.pallas_call(
        kernel,
        out_shape=jax.ShapeDtypeStruct((rows_pad, _LANE), jnp.float32),
        grid_spec=pltpu.PrefetchScalarGridSpec(
            num_scalar_prefetch=0,
            grid=(steps,),
            in_specs=[pl.BlockSpec((c, tm, _LANE), lambda i: (0, i, 0)),
                      pl.BlockSpec((tm, _LANE), lambda i: (i, 0))],
            out_specs=pl.BlockSpec((tm, _LANE), lambda i: (i, 0))),
        compiler_params=pltpu.CompilerParams(
            dimension_semantics=("parallel",)),
    )(logits_cm, tgt)

    loss = out.reshape(-1)[:n].reshape(-1, 1)  # torch returns shape (N, 1)
    if reduction == "mean":
        return loss.mean()
    if reduction == "sum":
        return loss.sum()
    return loss


def _reference(predict, target, gamma=2, alpha=None):
    """Plain-JAX reference mirroring the PyTorch forward."""
    predict = predict.astype(jnp.float32)
    c = predict.shape[1]
    pt = jax.nn.softmax(predict, axis=1)
    onehot = jax.nn.one_hot(target, c, dtype=jnp.float32)
    probs = (pt * onehot).sum(axis=1, keepdims=True)
    log_p = jnp.log(probs)
    alpha_vec = (jnp.ones((c,), jnp.float32) if alpha is None
                 else jnp.asarray(alpha, jnp.float32).reshape(-1))
    a = alpha_vec[target].reshape(-1, 1)
    return -a * (1.0 - probs) ** gamma * log_p


if __name__ == "__main__":
    key = jax.random.PRNGKey(0)
    k1, k2 = jax.random.split(key)
    n, class_num = 200, 4          # n not a multiple of 128 -> exercises padding
    predict = jax.random.normal(k1, (n, class_num), jnp.float32) * 2.0
    target = jax.random.randint(k2, (n,), 0, class_num)

    # alpha=None path (the module default)
    loss = jax.block_until_ready(multi_ce_focal_loss(predict, target, gamma=2))
    ref = jax.block_until_ready(_reference(predict, target, gamma=2))
    assert loss.shape == (n, 1), loss.shape
    max_err = float(jnp.max(jnp.abs(loss - ref)))
    assert max_err < 1e-3, f"max abs error {max_err}"

    # per-class alpha path (static tuple, applied in-kernel with selects)
    alpha = (0.25, 0.5, 0.75, 1.0)
    loss_a = jax.block_until_ready(
        multi_ce_focal_loss(predict, target, gamma=2, alpha=alpha))
    ref_a = jax.block_until_ready(_reference(predict, target, gamma=2, alpha=alpha))
    max_err_a = float(jnp.max(jnp.abs(loss_a - ref_a)))
    assert max_err_a < 1e-3, f"max abs error (alpha) {max_err_a}"

    print("KERNEL_OK")
</pallas_src>

<mosaic_0001>
module attributes {stable_mosaic.version = 11 : i64} {
  func.func @_focal_kernel(%arg0: i32, %arg1: memref<4x8x128xf32, #tpu.memory_space<vmem>>, %arg2: memref<8x128xi32, #tpu.memory_space<vmem>>, %arg3: memref<8x128xf32, #tpu.memory_space<vmem>>) attributes {dimension_semantics = [#tpu.dimension_semantics<parallel>], iteration_bounds = array<i64: 1>, scalar_prefetch = 0 : i64, scratch_operands = 0 : i64, tpu.core_type = #tpu.core_type<tc>, window_params = [{transform_indices = @transform_0, window_bounds = array<i64: 4, 8, 128>}, {transform_indices = @transform_1, window_bounds = array<i64: 8, 128>}, {transform_indices = @transform_2, window_bounds = array<i64: 8, 128>}]} {
    %c0 = arith.constant 0 : index
    %c0_0 = arith.constant 0 : index
    %0 = vector.load %arg2[%c0, %c0_0] : memref<8x128xi32, #tpu.memory_space<vmem>>, vector<8x128xi32>
    %c0_1 = arith.constant 0 : index
    %c0_2 = arith.constant 0 : index
    %c0_3 = arith.constant 0 : index
    %1 = vector.load %arg1[%c0_1, %c0_2, %c0_3] : memref<4x8x128xf32, #tpu.memory_space<vmem>>, vector<1x8x128xf32>
    %2 = vector.shape_cast %1 : vector<1x8x128xf32> to vector<8x128xf32>
    %c1 = arith.constant 1 : index
    %c0_4 = arith.constant 0 : index
    %c0_5 = arith.constant 0 : index
    %3 = vector.load %arg1[%c1, %c0_4, %c0_5] : memref<4x8x128xf32, #tpu.memory_space<vmem>>, vector<1x8x128xf32>
    %4 = vector.shape_cast %3 : vector<1x8x128xf32> to vector<8x128xf32>
    %c2 = arith.constant 2 : index
    %c0_6 = arith.constant 0 : index
    %c0_7 = arith.constant 0 : index
    %5 = vector.load %arg1[%c2, %c0_6, %c0_7] : memref<4x8x128xf32, #tpu.memory_space<vmem>>, vector<1x8x128xf32>
    %6 = vector.shape_cast %5 : vector<1x8x128xf32> to vector<8x128xf32>
    %c3 = arith.constant 3 : index
    %c0_8 = arith.constant 0 : index
    %c0_9 = arith.constant 0 : index
    %7 = vector.load %arg1[%c3, %c0_8, %c0_9] : memref<4x8x128xf32, #tpu.memory_space<vmem>>, vector<1x8x128xf32>
    %8 = vector.shape_cast %7 : vector<1x8x128xf32> to vector<8x128xf32>
    %9 = arith.maximumf %2, %4 : vector<8x128xf32>
    %10 = arith.maximumf %9, %6 : vector<8x128xf32>
    %11 = arith.maximumf %10, %8 : vector<8x128xf32>
    %cst = arith.constant 0.000000e+00 : f32
    %12 = vector.broadcast %cst : f32 to vector<8x128xf32>
    %cst_10 = arith.constant 0.000000e+00 : f32
    %13 = vector.broadcast %cst_10 : f32 to vector<8x128xf32>
    %cst_11 = arith.constant 0.000000e+00 : f32
    %14 = vector.broadcast %cst_11 : f32 to vector<8x128xf32>
    %15 = arith.subf %2, %11 : vector<8x128xf32>
    %16 = math.exp %15 : vector<8x128xf32>
    %17 = arith.addf %12, %16 : vector<8x128xf32>
    %c0_i32 = arith.constant 0 : i32
    %18 = vector.broadcast %c0_i32 : i32 to vector<8x128xi32>
    %19 = arith.cmpi eq, %0, %18 : vector<8x128xi32>
    %20 = arith.select %19, %15, %13 : vector<8x128xi1>, vector<8x128xf32>
    %21 = arith.select %19, %16, %14 : vector<8x128xi1>, vector<8x128xf32>
    %22 = arith.subf %4, %11 : vector<8x128xf32>
    %23 = math.exp %22 : vector<8x128xf32>
    %24 = arith.addf %17, %23 : vector<8x128xf32>
    %c1_i32 = arith.constant 1 : i32
    %25 = vector.broadcast %c1_i32 : i32 to vector<8x128xi32>
    %26 = arith.cmpi eq, %0, %25 : vector<8x128xi32>
    %27 = arith.select %26, %22, %20 : vector<8x128xi1>, vector<8x128xf32>
    %28 = arith.select %26, %23, %21 : vector<8x128xi1>, vector<8x128xf32>
    %29 = arith.subf %6, %11 : vector<8x128xf32>
    %30 = math.exp %29 : vector<8x128xf32>
    %31 = arith.addf %24, %30 : vector<8x128xf32>
    %c2_i32 = arith.constant 2 : i32
    %32 = vector.broadcast %c2_i32 : i32 to vector<8x128xi32>
    %33 = arith.cmpi eq, %0, %32 : vector<8x128xi32>
    %34 = arith.select %33, %29, %27 : vector<8x128xi1>, vector<8x128xf32>
    %35 = arith.select %33, %30, %28 : vector<8x128xi1>, vector<8x128xf32>
    %36 = arith.subf %8, %11 : vector<8x128xf32>
    %37 = math.exp %36 : vector<8x128xf32>
    %38 = arith.addf %31, %37 : vector<8x128xf32>
    %c3_i32 = arith.constant 3 : i32
    %39 = vector.broadcast %c3_i32 : i32 to vector<8x128xi32>
    %40 = arith.cmpi eq, %0, %39 : vector<8x128xi32>
    %41 = arith.select %40, %36, %34 : vector<8x128xi1>, vector<8x128xf32>
    %42 = arith.select %40, %37, %35 : vector<8x128xi1>, vector<8x128xf32>
    %43 = arith.divf %42, %38 : vector<8x128xf32>
    %44 = math.log %38 : vector<8x128xf32>
    %45 = arith.subf %41, %44 : vector<8x128xf32>
    %cst_12 = arith.constant 1.000000e+00 : f32
    %46 = vector.broadcast %cst_12 : f32 to vector<8x128xf32>
    %47 = arith.subf %46, %43 : vector<8x128xf32>
    %cst_13 = arith.constant 0.000000e+00 : f32
    %48 = vector.broadcast %cst_13 : f32 to vector<8x128xf32>
    %49 = arith.maximumf %47, %48 : vector<8x128xf32>
    %50 = arith.mulf %49, %49 : vector<8x128xf32>
    %cst_14 = arith.constant 0.000000e+00 : f32
    %51 = vector.broadcast %cst_14 : f32 to vector<8x128xf32>
    %52 = arith.subf %51, %50 : vector<8x128xf32>
    %53 = arith.mulf %52, %45 : vector<8x128xf32>
    %c0_15 = arith.constant 0 : index
    %c0_16 = arith.constant 0 : index
    %54 = vector.load %arg3[%c0_15, %c0_16] : memref<8x128xf32, #tpu.memory_space<vmem>>, vector<8x128xf32>
    tpu.vector_store %arg3[%c0_15, %c0_16], %53 {strides = array<i32>} : memref<8x128xf32, #tpu.memory_space<vmem>>, vector<8x128xf32>,
    return
  }
  func.func @transform_0(%arg0: i32) -> (i32, i32, i32) {
    %c0_i32 = arith.constant 0 : i32
    %c0_i32_0 = arith.constant 0 : i32
    %c0_i32_1 = arith.constant 0 : i32
    return %c0_i32, %arg0, %c0_i32_0 : i32, i32, i32
  }
  func.func @transform_1(%arg0: i32) -> (i32, i32) {
    %c0_i32 = arith.constant 0 : i32
    %c0_i32_0 = arith.constant 0 : i32
    return %arg0, %c0_i32 : i32, i32
  }
  func.func @transform_2(%arg0: i32) -> (i32, i32) {
    %c0_i32 = arith.constant 0 : i32
    %c0_i32_0 = arith.constant 0 : i32
    return %arg0, %c0_i32 : i32, i32
  }
}

</mosaic_0001>

<bundles_post_ra>
// kernel: multi_ce_focal_loss.1
= control target key start
LH: loop header
LB: loop body
LE: loop exit
PB: predicated region body
PF: predicated region fallthrough
CT: control target
= control target key end

     0   :  { %s113_s0 = inlined_call_operand.vmem [shape: f32[4,8,128], index: 0, kind: input, shape index: {}]   ;;  %s114_s1 = inlined_call_operand.vmem [shape: s32[8,128], index: 1, kind: input, shape index: {}]   ;;  %s115_s2 = inlined_call_operand.vmem [shape: f32[8,128], index: 2, kind: output, shape index: {}]  }
   0x1   :  { %v12_v0 = vld [vmem:[%s113_s0] sm:$0xff]  ;;  %v65_v1 = vld [vmem:[%s113_s0 + $0x8] sm:$0xff]  ;;  %v66_v2 = vld [vmem:[%s113_s0 + $0x10] sm:$0xff] }
   0x2   :  { %v19_v3 = vmax.f32 %v12_v0, %v65_v1  ;;  %v67_v4 = vld [vmem:[%s113_s0 + $0x18] sm:$0xff]  ;;  %v11_v17 = vld [vmem:[%s114_s1] sm:$0xff] }
   0x3   :  { %vm26_vm0 = vcmp.eq.s32.totalorder %v11_v17, 0  ;;  %vm33_vm1 = vcmp.eq.s32.totalorder %v11_v17, 1  ;;  %vm40_vm2 = vcmp.eq.s32.totalorder %v11_v17, 2  ;;  %vm47_vm3 = vcmp.eq.s32.totalorder %v11_v17, 3 }
   0x4   :  { %v20_v5 = vmax.f32 %v19_v3, %v66_v2 }
   0x6   :  { %v21_v6 = vmax.f32 %v20_v5, %v67_v4 }
   0x8   :  { %v22_v7 = vsub.f32 %v12_v0, %v21_v6  ;;  %v29_v8 = vsub.f32 %v65_v1, %v21_v6  ;;  %v36_v9 = vsub.f32 %v66_v2, %v21_v6  ;;  %v43_v10 = vsub.f32 %v67_v4, %v21_v6 }
   0xa   :  { %v23_v11 = vmul.f32 1.442695, %v22_v7  ;;  %v30_v12 = vmul.f32 1.442695, %v29_v8  ;;  %v37_v13 = vmul.f32 1.442695, %v36_v9 }
   0xb   :  { %v44_v14 = vmul.f32 1.442695, %v43_v10  ;;  %v27_v25 = vsel %vm26_vm0, %v22_v7, 0.0 }
   0xc   :  { %68 = vpow2.f32 %v23_v11  ;;  %v34_v27 = vsel %vm33_vm1, %v29_v8, %v27_v25 }
   0xd   :  { %70 = vpow2.f32 %v30_v12  ;;  %v41_v31 = vsel %vm40_vm2, %v36_v9, %v34_v27 }
   0xe   :  { %72 = vpow2.f32 %v37_v13  ;;  %v48_v35 = vsel %vm47_vm3, %v43_v10, %v41_v31 }
   0xf   :  { %74 = vpow2.f32 %v44_v14 }
  0x16   :  { %v69_v15 = vpop.eup %68 }
  0x17   :  { %v71_v16 = vpop.eup %70  ;;  %v28_v23 = vsel %vm26_vm0, %v69_v15, 0.0 }
  0x18   :  { %v73_v18 = vpop.eup %72  ;;  %v32_v19 = vadd.f32 %v71_v16, %v69_v15  ;;  %v35_v24 = vsel %vm33_vm1, %v71_v16, %v28_v23 }
  0x19   :  { %v75_v20 = vpop.eup %74  ;;  %v42_v26 = vsel %vm40_vm2, %v73_v18, %v35_v24 }
  0x1a   :  { %v39_v21 = vadd.f32 %v73_v18, %v32_v19  ;;  %v49_v28 = vsel %vm47_vm3, %v75_v20, %v42_v26 }
  0x1c   :  { %v46_v22 = vadd.f32 %v75_v20, %v39_v21 }
  0x1e   :  { %76 = vrcp.f32 %v46_v22 }
  0x1f   :  { %78 = vlog2.f32 %v46_v22 }
  0x28   :  { %v77_v29 = vpop.eup %76 }
  0x29   :  { %v79_v30 = vpop.eup %78  ;;  %v51_v32 = vmul.f32 %v77_v29, %v49_v28 }
  0x2a   :  { %v53_v33 = vmul.f32 0.6931472, %v79_v30 }
  0x2b   :  { %v55_v34 = vsub.f32 1.0, %v51_v32 }
  0x2c   :  { %v54_v37 = vsub.f32 %v48_v35, %v53_v33 }
  0x2d   :  { %v56_v36 = vmax.f32 %v55_v34, 0.0 }
  0x2f   :  { %v57_v38 = vmul.f32 %v56_v36, %v56_v36 }
  0x31   :  { %v58_v39 = vsub.f32 0.0, %v57_v38 }
  0x33   :  { %v59_v40 = vmul.f32 %v58_v39, %v54_v37 }
  0x35   :  { %60 = vst [vmem:[%s115_s2] sm:$0xff] %v59_v40 }

</bundles_post_ra>
